<compile_context>
chip_gen: v6e
topology: v6e:2x2x1
jax: 0.10.0
libtpu: 0.0.40
codegen_flags: <defaults>
</compile_context>

<pallas_src>
import functools

import jax
import jax.numpy as jnp
from jax.experimental import pallas as pl
from jax.experimental.pallas import tpu as pltpu


def _round_up(x, m):
    return (x + m - 1) // m * m


def _proj_kernel(p_ref, w_ref, b_ref, o_ref):
    # p_ref: (TILE_N, K)     streamed patch-row tile
    # w_ref: (K, E_pad)      projection matrix, resident across the grid
    # b_ref: (1, E_pad)      bias (f32), resident
    # o_ref: (TILE_N, E_pad)
    acc = jnp.dot(p_ref[...], w_ref[...], preferred_element_type=jnp.float32)
    o_ref[...] = (acc + b_ref[...]).astype(o_ref.dtype)


def patch_embed_forward(x, weight, bias, *, patch_size, tubelet_size,
                        compute_dtype=None, channels_last=False):
    """x:      (B, C, T, H, W)         (PyTorch NCDHW layout)
       weight: (E, C, kt, ph, pw)      (PyTorch Conv3d weight layout)
       bias:   (E,)
       returns (B, E, T//kt, H//ph, W//pw), or (B, T//kt, H//ph, W//pw, E)
       when channels_last=True (skips the final relayout)."""
    B, C, T, H, W = x.shape
    E = weight.shape[0]
    ph, pw = patch_size
    kt = tubelet_size
    Tp, Hp, Wp = T // kt, H // ph, W // pw
    N = B * Tp * Hp * Wp
    K = C * kt * ph * pw

    out_dtype = x.dtype
    cdtype = jnp.dtype(compute_dtype) if compute_dtype is not None else jnp.dtype(x.dtype)

    # --- XLA glue: extract non-overlapping patches -> (N, K). Run under jit so
    # the cast + transpose + pad fuse into one copy pass. ---
    xc = x.astype(cdtype)                       # cast first: halves relayout bytes for bf16
    xp = xc.reshape(B, C, Tp, kt, Hp, ph, Wp, pw)
    xp = xp.transpose(0, 2, 4, 6, 1, 3, 5, 7)   # (B, Tp, Hp, Wp, C, kt, ph, pw)
    patches = xp.reshape(N, K)

    # weight (E, C, kt, ph, pw) -> (K, E); zero-pad E to a lane-dense multiple
    # of 128 (unmasked vst on the output, full MXU column fill).
    E_pad = _round_up(E, 128)
    w2d = weight.reshape(E, K).T.astype(cdtype)
    b2d = bias.reshape(1, E).astype(jnp.float32)
    if E_pad != E:
        w2d = jnp.pad(w2d, ((0, 0), (0, E_pad - E)))
        b2d = jnp.pad(b2d, ((0, 0), (0, E_pad - E)))

    in_bytes = jnp.dtype(cdtype).itemsize
    out_bytes = jnp.dtype(out_dtype).itemsize

    # --- row tiling: biggest tile whose double-buffered in/out tiles plus the
    # resident weight fit a conservative VMEM budget (safe on 64 MiB v7x). ---
    budget = 24 << 20
    resident = K * E_pad * in_bytes + 2 * E_pad * 4
    per_row = 2 * (K * in_bytes + E_pad * out_bytes)       # 2x = double buffered
    tile_cap = max(8, (budget - resident) // per_row)
    TILE_N = int(min(1024, _round_up(min(N, tile_cap), 8)))
    N_pad = _round_up(N, TILE_N)
    if N_pad != N:
        patches = jnp.pad(patches, ((0, N_pad - N), (0, 0)))
    grid = (N_pad // TILE_N,)

    vmem_needed = (2 * TILE_N * K * in_bytes
                   + 2 * TILE_N * E_pad * out_bytes
                   + K * E_pad * in_bytes
                   + 2 * E_pad * 4)
    vmem_limit = int(max(32 << 20, min(int(vmem_needed * 1.5) + (4 << 20), 64 << 20)))

    cost = pl.CostEstimate(
        flops=2 * N_pad * K * E_pad,
        transcendentals=0,
        bytes_accessed=(N_pad * K * in_bytes
                        + K * E_pad * in_bytes
                        + N_pad * E_pad * out_bytes),
    )

    out = pl.pallas_call(
        _proj_kernel,
        out_shape=jax.ShapeDtypeStruct((N_pad, E_pad), out_dtype),
        grid_spec=pl.GridSpec(
            grid=grid,
            in_specs=[
                pl.BlockSpec((TILE_N, K), lambda i: (i, 0)),   # streamed patch rows
                pl.BlockSpec((K, E_pad), lambda i: (0, 0)),    # resident weight
                pl.BlockSpec((1, E_pad), lambda i: (0, 0)),    # resident bias
            ],
            out_specs=pl.BlockSpec((TILE_N, E_pad), lambda i: (i, 0)),
        ),
        compiler_params=pltpu.CompilerParams(
            dimension_semantics=("parallel",),
            vmem_limit_bytes=vmem_limit,
        ),
        cost_estimate=cost,
    )(patches, w2d, b2d)

    # Strip N / E padding; kernel emits the lane-dense channels-last layout.
    out = out[:N, :E].reshape(B, Tp, Hp, Wp, E)
    if channels_last:
        return out
    # Match PyTorch Conv3d NCDHW output (channels_last=True skips this extra
    # HBM relayout when the consumer flattens to (B, N, E) tokens anyway).
    return out.transpose(0, 4, 1, 2, 3)


if __name__ == "__main__":
    # Small shapes consistent with the module: patch_size=4, tubelet(kernel)=2,
    # in_chans=4, embed_dim=32, batch=2, T=4, H=W=16.
    B, C, T, H, W = 2, 4, 4, 16, 16
    E = 32
    patch = (4, 4)
    kt = 2

    key = jax.random.PRNGKey(0)
    kx, kw, kb = jax.random.split(key, 3)

    x = jax.random.normal(kx, (B, C, T, H, W), dtype=jnp.float32)
    fan_in = C * kt * patch[0] * patch[1]
    bound = 1.0 / (fan_in ** 0.5)
    weight = jax.random.uniform(kw, (E, C, kt, patch[0], patch[1]),
                                minval=-bound, maxval=bound, dtype=jnp.float32)
    bias = jax.random.uniform(kb, (E,), minval=-bound, maxval=bound,
                              dtype=jnp.float32)

    # Reference: Conv3d via lax.conv_general_dilated (NCDHW, OIDHW).
    ref = jax.lax.conv_general_dilated(
        x, weight,
        window_strides=(kt, patch[0], patch[1]),
        padding="VALID",
        dimension_numbers=("NCDHW", "OIDHW", "NCDHW"),
    ) + bias.reshape(1, E, 1, 1, 1)

    # f32 path (jit fuses the pre-kernel relayout glue into one pass).
    fwd = jax.jit(functools.partial(patch_embed_forward,
                                    patch_size=patch, tubelet_size=kt))
    out = jax.block_until_ready(fwd(x, weight, bias))
    assert out.shape == (B, E, T // kt, H // patch[0], W // patch[1])
    assert jnp.allclose(out, ref, atol=1e-4, rtol=1e-4)

    # bf16-operand path (halves HBM bytes on this mem-bound op; f32 accumulate).
    fwd_bf16 = jax.jit(functools.partial(patch_embed_forward,
                                         patch_size=patch, tubelet_size=kt,
                                         compute_dtype=jnp.bfloat16))
    out_bf16 = jax.block_until_ready(fwd_bf16(x, weight, bias))
    assert out_bf16.shape == out.shape
    assert jnp.allclose(out_bf16, ref, atol=5e-2, rtol=5e-2)

    # channels-last tokens path (skips the final NCDHW relayout).
    fwd_cl = jax.jit(functools.partial(patch_embed_forward,
                                       patch_size=patch, tubelet_size=kt,
                                       channels_last=True))
    out_cl = jax.block_until_ready(fwd_cl(x, weight, bias))
    assert jnp.allclose(out_cl.transpose(0, 4, 1, 2, 3), ref, atol=1e-4, rtol=1e-4)

    print("KERNEL_OK")
</pallas_src>

<mosaic_0001>
module attributes {stable_mosaic.version = 11 : i64} {
  func.func @_proj_kernel(%arg0: i32, %arg1: memref<64x128xf32, #tpu.memory_space<vmem>>, %arg2: memref<128x128xf32, #tpu.memory_space<vmem>>, %arg3: memref<1x128xf32, #tpu.memory_space<vmem>>, %arg4: memref<64x128xf32, #tpu.memory_space<vmem>>) attributes {dimension_semantics = [#tpu.dimension_semantics<parallel>], iteration_bounds = array<i64: 1>, scalar_prefetch = 0 : i64, scratch_operands = 0 : i64, tpu.core_type = #tpu.core_type<tc>, window_params = [{transform_indices = @transform_0, window_bounds = array<i64: 64, 128>}, {pipeline_mode = #tpu.pipeline_mode<synchronous>, transform_indices = @transform_1, window_bounds = array<i64: 128, 128>}, {pipeline_mode = #tpu.pipeline_mode<synchronous>, transform_indices = @transform_2, window_bounds = array<i64: 1, 128>}, {transform_indices = @transform_3, window_bounds = array<i64: 64, 128>}]} {
    %c0 = arith.constant 0 : index
    %c0_0 = arith.constant 0 : index
    %0 = vector.load %arg1[%c0, %c0_0] : memref<64x128xf32, #tpu.memory_space<vmem>>, vector<64x128xf32>
    %c0_1 = arith.constant 0 : index
    %c0_2 = arith.constant 0 : index
    %1 = vector.load %arg2[%c0_1, %c0_2] : memref<128x128xf32, #tpu.memory_space<vmem>>, vector<128x128xf32>
    %cst = arith.constant dense<0.000000e+00> : vector<64x128xf32>
    %2 = tpu.matmul %0, %1, %cst {dimension_numbers = #tpu.dot_dimension_numbers<[1], [0], [0], [1], [0, 0, 1, 1], [], []>} : vector<64x128xf32>, vector<128x128xf32>, vector<64x128xf32> -> vector<64x128xf32>
    %c0_3 = arith.constant 0 : index
    %c0_4 = arith.constant 0 : index
    %3 = vector.load %arg3[%c0_3, %c0_4] : memref<1x128xf32, #tpu.memory_space<vmem>>, vector<1x128xf32>
    %4 = vector.broadcast %3 : vector<1x128xf32> to vector<64x128xf32>
    %5 = arith.addf %2, %4 : vector<64x128xf32>
    %c0_5 = arith.constant 0 : index
    %c0_6 = arith.constant 0 : index
    %6 = vector.load %arg4[%c0_5, %c0_6] : memref<64x128xf32, #tpu.memory_space<vmem>>, vector<64x128xf32>
    tpu.vector_store %arg4[%c0_5, %c0_6], %5 {strides = array<i32>} : memref<64x128xf32, #tpu.memory_space<vmem>>, vector<64x128xf32>,
    return
  }
  func.func @transform_0(%arg0: i32) -> (i32, i32) {
    %c0_i32 = arith.constant 0 : i32
    %c0_i32_0 = arith.constant 0 : i32
    return %arg0, %c0_i32 : i32, i32
  }
  func.func @transform_1(%arg0: i32) -> (i32, i32) {
    %c0_i32 = arith.constant 0 : i32
    %c0_i32_0 = arith.constant 0 : i32
    %c0_i32_1 = arith.constant 0 : i32
    return %c0_i32, %c0_i32_0 : i32, i32
  }
  func.func @transform_2(%arg0: i32) -> (i32, i32) {
    %c0_i32 = arith.constant 0 : i32
    %c0_i32_0 = arith.constant 0 : i32
    %c0_i32_1 = arith.constant 0 : i32
    return %c0_i32, %c0_i32_0 : i32, i32
  }
  func.func @transform_3(%arg0: i32) -> (i32, i32) {
    %c0_i32 = arith.constant 0 : i32
    %c0_i32_0 = arith.constant 0 : i32
    return %arg0, %c0_i32 : i32, i32
  }
}

</mosaic_0001>

<bundles_post_ra>
// kernel: patch_embed_forward.1
= control target key start
LH: loop header
LB: loop body
LE: loop exit
PB: predicated region body
PF: predicated region fallthrough
CT: control target
= control target key end

     0   :  { %s402_s0 = inlined_call_operand.vmem [shape: f32[64,128], index: 0, kind: input, shape index: {}]   ;;  %s403_s1 = inlined_call_operand.vmem [shape: f32[128,128], index: 1, kind: input, shape index: {}]   ;;  %s404_s2 = inlined_call_operand.vmem [shape: f32[1,128], index: 2, kind: input, shape index: {}]   ;;  %s405_s3 = inlined_call_operand.hbm [shape: f32[64,128], index: 3, kind: output, shape index: {}]  }
   0x1   :  { %v38_v0 = vld [vmem:[%s403_s1 + $0x78] sm:$0xff]  ;;  %v37_v1 = vld [vmem:[%s403_s1 + $0x70] sm:$0xff]  ;;  %v36_v2 = vld [vmem:[%s403_s1 + $0x68] sm:$0xff] }
   0x2   :  { %200 = vmatprep.subr.mxu0 %v38_v0  ;;  %244 = vmatprep.subr.mxu1 %v38_v0  ;;  %v35_v3 = vld [vmem:[%s403_s1 + $0x60] sm:$0xff]  ;;  %v34_v4 = vld [vmem:[%s403_s1 + $0x58] sm:$0xff]  ;;  %v33_v5 = vld [vmem:[%s403_s1 + $0x50] sm:$0xff] }
   0x3   :  { %201 = vmatpush3.msra.mxu0 %v38_v0  ;;  %260 = vmatpush3.msra.mxu1 %v38_v0 }
   0x4   :  { %202 = vmatprep.subr.mxu0 %v37_v1  ;;  %245 = vmatprep.subr.mxu1 %v37_v1 }
   0x5   :  { %203 = vmatpush3.msra.mxu0 %v37_v1  ;;  %261 = vmatpush3.msra.mxu1 %v37_v1 }
   0x6   :  { %204 = vmatprep.subr.mxu0 %v36_v2  ;;  %246 = vmatprep.subr.mxu1 %v36_v2 }
   0x7   :  { %205 = vmatpush3.msra.mxu0 %v36_v2  ;;  %262 = vmatpush3.msra.mxu1 %v36_v2 }
   0x8   :  { %206 = vmatprep.subr.mxu0 %v35_v3  ;;  %247 = vmatprep.subr.mxu1 %v35_v3 }
   0x9   :  { %207 = vmatpush3.msra.mxu0 %v35_v3  ;;  %263 = vmatpush3.msra.mxu1 %v35_v3 }
   0xa   :  { %8 = vsyncpa [#allocation3], 0  ;;  %208 = vmatprep.subr.mxu0 %v34_v4  ;;  %248 = vmatprep.subr.mxu1 %v34_v4  ;;  %v32_v6 = vld [vmem:[%s403_s1 + $0x48] sm:$0xff]  ;;  %v31_v7 = vld [vmem:[%s403_s1 + $0x40] sm:$0xff]  ;;  %s301_s7 = smov [#allocation2]  }
   0xb   :  { %209 = vmatpush3.msra.mxu0 %v34_v4  ;;  %264 = vmatpush3.msra.mxu1 %v34_v4  ;;  %v30_v8 = vld [vmem:[%s403_s1 + $0x38] sm:$0xff]  ;;  %v29_v9 = vld [vmem:[%s403_s1 + $0x30] sm:$0xff]  ;;  %v28_v10 = vld [vmem:[%s403_s1 + $0x28] sm:$0xff]  ;;  %s164_s8 = sshll.u32 %s301_s7, 4  ;;  %s165_s8 = int_to_ptr.vmem [resolvable:$true] %s164_s8 }
   0xc   :  { %210 = vmatprep.subr.mxu0 %v33_v5  ;;  %249 = vmatprep.subr.mxu1 %v33_v5  ;;  %v27_v11 = vld [vmem:[%s403_s1 + $0x20] sm:$0xff]  ;;  %v26_v12 = vld [vmem:[%s403_s1 + $0x18] sm:$0xff]  ;;  %v25_v13 = vld [vmem:[%s403_s1 + $0x10] sm:$0xff]  ;;  %p284_p1 = scmp.lt.s32.totalorder %s165_s8, %s165_s8 }
   0xd   :  { %211 = vmatpush3.msra.mxu0 %v33_v5  ;;  %265 = vmatpush3.msra.mxu1 %v33_v5  ;;  %v24_v14 = vld [vmem:[%s403_s1 + $0x8] sm:$0xff]  ;;  %v23_v15 = vld [vmem:[%s403_s1] sm:$0xff]  ;;  %v17_v20 = vld [vmem:[%s402_s0 + $0x10] sm:$0xff] }
   0xe   :  { %212 = vmatprep.subr.mxu0 %v32_v6  ;;  %250 = vmatprep.subr.mxu1 %v32_v6  ;;  %v15_v16 = vld [vmem:[%s402_s0] sm:$0xff]  ;;  %v16_v18 = vld [vmem:[%s402_s0 + $0x8] sm:$0xff]  ;;  %v21_v21 = vld [vmem:[%s402_s0 + $0x30] sm:$0xff] }
   0xf   :  { %213 = vmatpush3.msra.mxu0 %v32_v6  ;;  %266 = vmatpush3.msra.mxu1 %v32_v6  ;;  %v19_v17 = vld [vmem:[%s402_s0 + $0x20] sm:$0xff]  ;;  %v20_v19 = vld [vmem:[%s402_s0 + $0x28] sm:$0xff]  ;;  %v18_v22 = vld [vmem:[%s402_s0 + $0x18] sm:$0xff] }
  0x10   :  { %214 = vmatprep.subr.mxu0 %v31_v7  ;;  %251 = vmatprep.subr.mxu1 %v31_v7  ;;  %v22_v23 = vld [vmem:[%s402_s0 + $0x38] sm:$0xff]  ;;  %v175_v24 = vld [vmem:[%s404_s2] ss:$0 sm:$0xff]  ;;  %s279_s0 = scalar_lea.vmem %s165_s8, 1024 }
  0x11   :  { %215 = vmatpush3.msra.mxu0 %v31_v7  ;;  %267 = vmatpush3.msra.mxu1 %v31_v7  ;;  %p280_p0 = scmp.ne.s32.totalorder %s165_s8, %s279_s0  ;;  %p285_p2 = scmp.lt.s32.totalorder %s279_s0, %s279_s0 }
  0x12   :  { %216 = vmatprep.subr.mxu0 %v30_v8  ;;  %252 = vmatprep.subr.mxu1 %v30_v8 }
  0x13   :  { %217 = vmatpush3.msra.mxu0 %v30_v8  ;;  %268 = vmatpush3.msra.mxu1 %v30_v8  ;;  %p286_p3 = por %p285_p2, %p284_p1 }
  0x14   :  { %218 = vmatprep.subr.mxu0 %v29_v9  ;;  %253 = vmatprep.subr.mxu1 %v29_v9 }
  0x15   :  { %219 = vmatpush3.msra.mxu0 %v29_v9  ;;  %269 = vmatpush3.msra.mxu1 %v29_v9  ;;  %p287_p4 = pnand %p286_p3, %p280_p0 }
  0x16   :  { %220 = vmatprep.subr.mxu0 %v28_v10  ;;  %254 = vmatprep.subr.mxu1 %v28_v10 }
  0x17   :  { %221 = vmatpush3.msra.mxu0 %v28_v10  ;;  %270 = vmatpush3.msra.mxu1 %v28_v10 }
  0x18   :  { %222 = vmatprep.subr.mxu0 %v27_v11  ;;  %255 = vmatprep.subr.mxu1 %v27_v11 }
  0x19   :  { %223 = vmatpush3.msra.mxu0 %v27_v11  ;;  %271 = vmatpush3.msra.mxu1 %v27_v11 }
  0x1a   :  { %224 = vmatprep.subr.mxu0 %v26_v12  ;;  %256 = vmatprep.subr.mxu1 %v26_v12 }
  0x1b   :  { %225 = vmatpush3.msra.mxu0 %v26_v12  ;;  %272 = vmatpush3.msra.mxu1 %v26_v12 }
  0x1c   :  { %226 = vmatprep.subr.mxu0 %v25_v13  ;;  %257 = vmatprep.subr.mxu1 %v25_v13 }
  0x1d   :  { %227 = vmatpush3.msra.mxu0 %v25_v13  ;;  %273 = vmatpush3.msra.mxu1 %v25_v13 }
  0x1e   :  { %228 = vmatprep.subr.mxu0 %v24_v14  ;;  %258 = vmatprep.subr.mxu1 %v24_v14 }
  0x1f   :  { %229 = vmatpush3.msra.mxu0 %v24_v14  ;;  %274 = vmatpush3.msra.mxu1 %v24_v14 }
  0x20   :  { %230 = vmatprep.subr.mxu0 %v23_v15  ;;  %259 = vmatprep.subr.mxu1 %v23_v15 }
  0x21   :  { %231 = vmatpush3.msra.mxu0 %v23_v15  ;;  %275 = vmatpush3.msra.mxu1 %v23_v15 }
  0x22   :  { %232 = vmatprep.mubr.f32.mxu0 %v15_v16  ;;  %238 = vmatprep.mubr.f32.mxu1 %v19_v17 }
  0x23   :  { %233 = vmatmul.mubr.f32.vlgmr.msra.gmra.mxu0 %v16_v18  ;;  %239 = vmatmul.mubr.f32.vlgmr.msra.gmra.mxu1 %v20_v19 }
  0x24   :  { %235 = vmatprep.mubr.f32.mxu0 %v17_v20  ;;  %241 = vmatprep.mubr.f32.mxu1 %v21_v21 }
  0x27   :  { %236 = vmatmul.mubr.f32.gmra.mxu0 %v18_v22  ;;  %242 = vmatmul.mubr.f32.gmra.mxu1 %v22_v23 }
  0xe3   :  { %v234_v25 = vpop.f32.mrf.mxu0  ;;  %v240_v26 = vpop.f32.mrf.mxu1 }
  0xe4   :  { %v118_v27 = vadd.f32 %v234_v25, %v175_v24  ;;  %v138_v28 = vadd.f32 %v240_v26, %v175_v24 }
  0xe5   :  { %v112_v29 = vpop.f32.mrf.mxu0  ;;  %v132_v30 = vpop.f32.mrf.mxu1 }
  0xe6   :  { %152 = vst [vmem:[#allocation2 + $0x8] sm:$0xff] %v118_v27  ;;  %156 = vst [vmem:[#allocation2 + $0x28] sm:$0xff] %v138_v28  ;;  %v113_v31 = vadd.f32 %v175_v24, %v112_v29  ;;  %v133_v32 = vadd.f32 %v175_v24, %v132_v30 }
  0xe7   :  { %v237_v33 = vpop.f32.mrf.mxu0  ;;  %v243_v34 = vpop.f32.mrf.mxu1 }
  0xe8   :  { %151 = vst [vmem:[#allocation2] sm:$0xff] %v113_v31  ;;  %155 = vst [vmem:[#allocation2 + $0x20] sm:$0xff] %v133_v32  ;;  %v128_v35 = vadd.f32 %v237_v33, %v175_v24  ;;  %v148_v36 = vadd.f32 %v243_v34, %v175_v24 }
  0xe9   :  { %v122_v37 = vpop.f32.mrf.mxu0  ;;  %v142_v38 = vpop.f32.mrf.mxu1 }
  0xea   :  { %154 = vst [vmem:[#allocation2 + $0x18] sm:$0xff] %v128_v35  ;;  %158 = vst [vmem:[#allocation2 + $0x38] sm:$0xff] %v148_v36  ;;  %v123_v39 = vadd.f32 %v175_v24, %v122_v37  ;;  %v143_v40 = vadd.f32 %v175_v24, %v142_v38 }
  0xec   :  { %153 = vst [vmem:[#allocation2 + $0x10] sm:$0xff] %v123_v39  ;;  %157 = vst [vmem:[#allocation2 + $0x30] sm:$0xff] %v143_v40 }
  0xed   :  { %290 = shalt.err (!%p287_p4)
}
  0xee   :  { %s302_s2 = smov 128   ;;  %s303_s9 = smov 8  }
  0xef   :  { %170 = dma.vmem_to_hbm [thread:$0]  %s165_s8, 1024, %s405_s3, [#allocation3], %s302_s2, %s302_s2, %s303_s9  }
  0xf0   :  { %299 = dma.done.wait [#allocation3], 1024  }
  0xf1   :  { %300 = vsyncadd [#allocation3], 4294966272 }
  0xf2   :  { %174 = vsyncpa [#allocation3], 1 }

</bundles_post_ra>
